<compile_context>
chip_gen: v7x
topology: tpu7x:2x2x1
jax: 0.10.0
libtpu: 0.0.40
codegen_flags: <defaults>
</compile_context>

<pallas_src>
import jax
import jax.numpy as jnp
from jax.experimental import pallas as pl
from jax.experimental.pallas import tpu as pltpu

_LANE = 128
_SUBLANE = 8                      # f32 sublane multiple (second-to-last block dim)
_MAX_BLOCK_BATCH = 2048           # big tiles amortize per-step overhead / long DMAs
_MIN_GRID_STEPS = 2               # keep >=2 steps so v7x megacore can split batch
_HEADROOM_BYTES = 2 * 1024 * 1024 # compiler scratch / internal buffers


def _round_up(x, m):
    return (x + m - 1) // m * m


def _mlp_kernel(x_ref, w1_ref, b1_ref, w2_ref, b2_ref, o_ref):
    # fc1: [TB, in] @ [in, hidden] on the MXU. x is cast per-tile (streamed);
    # weights arrive already in bf16 (cast hoisted to the wrapper).
    h = jnp.dot(
        x_ref[...].astype(jnp.bfloat16),
        w1_ref[...],
        preferred_element_type=jnp.float32,
    )
    h = jnp.maximum(h + b1_ref[...], 0.0)          # bias + ReLU in f32 (VPU)
    # fc2: [TB, hidden] @ [hidden, out]
    y = jnp.dot(
        h.astype(jnp.bfloat16),
        w2_ref[...],
        preferred_element_type=jnp.float32,
    )
    y = y + b2_ref[...]
    o_ref[...] = jax.nn.sigmoid(y).astype(o_ref.dtype)   # sigmoid on the EUP


def _vmem_limit_bytes():
    """Generation-aware VMEM limit with headroom (v5e/v6e: 128 MiB, v7x: 64 MiB)."""
    try:
        cap = int(pltpu.get_tpu_info().vmem_capacity_bytes)
    except Exception:
        cap = 64 * 1024 * 1024    # conservative fallback (v7x per-TC physical)
    return int(min(cap * 3 // 4, 96 * 1024 * 1024))


def _resident_spec(shape):
    """BlockSpec for a grid-invariant (VMEM-resident) operand, single-buffered."""
    idx_map = lambda i: (0, 0)
    try:
        return pl.BlockSpec(shape, idx_map, pipeline_mode=pl.Buffered(1))
    except TypeError:
        # Older API without pipeline_mode: fall back to default buffering.
        return pl.BlockSpec(shape, idx_map)


def _pick_block_batch(in_features, hidden, out_features, vmem_limit, batch):
    # Resident operands: bf16 weights + f32 biases, single-buffered.
    resident = (2 * (in_features * hidden + hidden * out_features)
                + 4 * (hidden + out_features))
    budget = max(vmem_limit - resident - _HEADROOM_BYTES, 0)
    # Streamed per-row f32 bytes: double-buffered x tile, double-buffered out
    # tile, plus live hidden/output intermediates.
    per_row = 4 * (2 * in_features + 2 * out_features + 2 * hidden + out_features)
    tb = max(_SUBLANE, budget // max(per_row, 1))
    tb = (tb // _SUBLANE) * _SUBLANE
    tb = min(tb, _MAX_BLOCK_BATCH)
    # Keep at least _MIN_GRID_STEPS grid steps (v7x 2-TensorCore split).
    split_cap = _round_up(max(-(-batch // _MIN_GRID_STEPS), _SUBLANE), _SUBLANE)
    tb = min(tb, split_cap, _round_up(batch, _SUBLANE))
    return max(tb, _SUBLANE)


def mlp_forward(x, w1, b1, w2, b2, *, block_batch=None):
    """Fused MLP forward: sigmoid(relu(x @ w1 + b1) @ w2 + b2).

    x: [B, in]; w1: [in, hidden]; b1: [hidden]; w2: [hidden, out]; b2: [out].
    Weights are stored pre-transposed ([in, out]) relative to torch.nn.Linear.
    Precision: bf16 MXU inputs with f32 accumulation (fine for small/medium K).
    """
    B, in_features = x.shape
    hidden = w1.shape[1]
    out_features = w2.shape[1]

    # Hoist weight casts out of the kernel: bf16 halves resident VMEM and the
    # one-time weight DMA. Biases stay f32 (added to the f32 accumulator).
    w1_bf = w1.astype(jnp.bfloat16)
    w2_bf = w2.astype(jnp.bfloat16)
    b1_2d = b1.reshape(1, hidden).astype(jnp.float32)
    b2_2d = b2.reshape(1, out_features).astype(jnp.float32)

    vmem_limit = _vmem_limit_bytes()
    if block_batch is None:
        tb = _pick_block_batch(in_features, hidden, out_features, vmem_limit, B)
    else:
        tb = max(_SUBLANE, _round_up(block_batch, _SUBLANE))
    tb = min(tb, _round_up(B, _SUBLANE))

    grid = (pl.cdiv(B, tb),)   # ragged final tile handled by Pallas (no x pre-pad)

    flops = 2 * B * (in_features * hidden + hidden * out_features)
    bytes_accessed = (
        4 * (B * in_features + B * out_features + hidden + out_features)
        + 2 * (in_features * hidden + hidden * out_features)
    )

    out = pl.pallas_call(
        _mlp_kernel,
        out_shape=jax.ShapeDtypeStruct((B, out_features), x.dtype),
        grid=grid,
        in_specs=[
            pl.BlockSpec((tb, in_features), lambda i: (i, 0)),   # x: streamed
            _resident_spec((in_features, hidden)),               # w1 (bf16), resident
            _resident_spec((1, hidden)),                         # b1, resident
            _resident_spec((hidden, out_features)),              # w2 (bf16), resident
            _resident_spec((1, out_features)),                   # b2, resident
        ],
        out_specs=pl.BlockSpec((tb, out_features), lambda i: (i, 0)),
        compiler_params=pltpu.CompilerParams(
            dimension_semantics=("parallel",),   # batch tiles are independent
            vmem_limit_bytes=vmem_limit,
        ),
        cost_estimate=pl.CostEstimate(
            flops=flops,
            transcendentals=B * out_features,    # sigmoid
            bytes_accessed=bytes_accessed,
        ),
    )(x, w1_bf, b1_2d, w2_bf, b2_2d)
    return out


def init_linear_params(key, in_features, out_features, dtype=jnp.float32):
    """Deterministic init mimicking torch.nn.Linear default (uniform +-1/sqrt(in))."""
    k_w, k_b = jax.random.split(key)
    bound = 1.0 / jnp.sqrt(jnp.float32(in_features))
    # Stored already transposed: [in_features, out_features].
    w = jax.random.uniform(k_w, (in_features, out_features), dtype, -bound, bound)
    b = jax.random.uniform(k_b, (out_features,), dtype, -bound, bound)
    return w, b


if __name__ == "__main__":
    # Shapes consistent with the module: MLP(input_size=32, hidden=64, output=16).
    # batch=200 with block_batch=128 exercises a 2-step grid with a ragged final
    # tile (no pre-padding) and the unpadded 16-wide output head.
    batch, input_size, hidden_size, output_size = 200, 32, 64, 16

    key = jax.random.PRNGKey(0)
    k_x, k_fc1, k_fc2 = jax.random.split(key, 3)

    x = jax.random.normal(k_x, (batch, input_size), jnp.float32)
    w1, b1 = init_linear_params(k_fc1, input_size, hidden_size)
    w2, b2 = init_linear_params(k_fc2, hidden_size, output_size)

    # Pure-JAX f32 reference (kernel uses bf16 MXU inputs -> loosened tolerance).
    ref = jax.nn.sigmoid(jnp.maximum(x @ w1 + b1, 0.0) @ w2 + b2)

    # Explicit tiling (multi-step grid, ragged last tile).
    out = mlp_forward(x, w1, b1, w2, b2, block_batch=128)
    jax.block_until_ready(out)
    assert out.shape == (batch, output_size)
    assert jnp.allclose(out, ref, atol=2e-2, rtol=2e-2), (
        "max abs err = %f" % float(jnp.max(jnp.abs(out - ref)))
    )

    # Auto (VMEM-aware) tiling path.
    out_auto = mlp_forward(x, w1, b1, w2, b2)
    jax.block_until_ready(out_auto)
    assert jnp.allclose(out_auto, ref, atol=2e-2, rtol=2e-2), (
        "max abs err = %f" % float(jnp.max(jnp.abs(out_auto - ref)))
    )

    print("KERNEL_OK")
</pallas_src>

<mosaic_0001>
module attributes {stable_mosaic.version = 11 : i64} {
  func.func @_mlp_kernel(%arg0: i32, %arg1: memref<128x32xf32, #tpu.memory_space<vmem>>, %arg2: memref<32x64xbf16, #tpu.memory_space<vmem>>, %arg3: memref<1x64xf32, #tpu.memory_space<vmem>>, %arg4: memref<64x16xbf16, #tpu.memory_space<vmem>>, %arg5: memref<1x16xf32, #tpu.memory_space<vmem>>, %arg6: memref<128x16xf32, #tpu.memory_space<vmem>>) attributes {dimension_semantics = [#tpu.dimension_semantics<parallel>], iteration_bounds = array<i64: 2>, scalar_prefetch = 0 : i64, scratch_operands = 0 : i64, tpu.core_type = #tpu.core_type<tc>, window_params = [{transform_indices = @transform_0, window_bounds = array<i64: 128, 32>}, {pipeline_mode = #tpu.pipeline_mode<synchronous>, transform_indices = @transform_1, window_bounds = array<i64: 32, 64>}, {pipeline_mode = #tpu.pipeline_mode<synchronous>, transform_indices = @transform_2, window_bounds = array<i64: 1, 64>}, {pipeline_mode = #tpu.pipeline_mode<synchronous>, transform_indices = @transform_3, window_bounds = array<i64: 64, 16>}, {pipeline_mode = #tpu.pipeline_mode<synchronous>, transform_indices = @transform_4, window_bounds = array<i64: 1, 16>}, {transform_indices = @transform_5, window_bounds = array<i64: 128, 16>}]} {
    %c0 = arith.constant 0 : index
    %c0_0 = arith.constant 0 : index
    %0 = vector.load %arg1[%c0, %c0_0] : memref<128x32xf32, #tpu.memory_space<vmem>>, vector<128x32xf32>
    %1 = arith.truncf %0 : vector<128x32xf32> to vector<128x32xbf16>
    %c0_1 = arith.constant 0 : index
    %c0_2 = arith.constant 0 : index
    %2 = vector.load %arg2[%c0_1, %c0_2] : memref<32x64xbf16, #tpu.memory_space<vmem>>, vector<32x64xbf16>
    %cst = arith.constant dense<0.000000e+00> : vector<128x64xf32>
    %3 = tpu.matmul %1, %2, %cst {dimension_numbers = #tpu.dot_dimension_numbers<[1], [0], [0], [1], [0, 0, 1, 1], [], []>} : vector<128x32xbf16>, vector<32x64xbf16>, vector<128x64xf32> -> vector<128x64xf32>
    %c0_3 = arith.constant 0 : index
    %c0_4 = arith.constant 0 : index
    %4 = vector.load %arg3[%c0_3, %c0_4] : memref<1x64xf32, #tpu.memory_space<vmem>>, vector<1x64xf32>
    %5 = vector.broadcast %4 : vector<1x64xf32> to vector<128x64xf32>
    %6 = arith.addf %3, %5 : vector<128x64xf32>
    %cst_5 = arith.constant 0.000000e+00 : f32
    %7 = vector.broadcast %cst_5 : f32 to vector<128x64xf32>
    %8 = arith.maximumf %6, %7 : vector<128x64xf32>
    %9 = arith.truncf %8 : vector<128x64xf32> to vector<128x64xbf16>
    %c0_6 = arith.constant 0 : index
    %c0_7 = arith.constant 0 : index
    %10 = vector.load %arg4[%c0_6, %c0_7] : memref<64x16xbf16, #tpu.memory_space<vmem>>, vector<64x16xbf16>
    %cst_8 = arith.constant dense<0.000000e+00> : vector<128x16xf32>
    %11 = tpu.matmul %9, %10, %cst_8 {dimension_numbers = #tpu.dot_dimension_numbers<[1], [0], [0], [1], [0, 0, 1, 1], [], []>} : vector<128x64xbf16>, vector<64x16xbf16>, vector<128x16xf32> -> vector<128x16xf32>
    %c0_9 = arith.constant 0 : index
    %c0_10 = arith.constant 0 : index
    %12 = vector.load %arg5[%c0_9, %c0_10] : memref<1x16xf32, #tpu.memory_space<vmem>>, vector<1x16xf32>
    %13 = vector.broadcast %12 : vector<1x16xf32> to vector<128x16xf32>
    %14 = arith.addf %11, %13 : vector<128x16xf32>
    %15 = arith.negf %14 : vector<128x16xf32>
    %16 = math.exp %15 : vector<128x16xf32>
    %cst_11 = arith.constant 1.000000e+00 : f32
    %17 = vector.broadcast %cst_11 : f32 to vector<128x16xf32>
    %18 = arith.addf %17, %16 : vector<128x16xf32>
    %19 = arith.divf %17, %18 : vector<128x16xf32>
    %c0_12 = arith.constant 0 : index
    %c0_13 = arith.constant 0 : index
    %20 = vector.load %arg6[%c0_12, %c0_13] : memref<128x16xf32, #tpu.memory_space<vmem>>, vector<128x16xf32>
    tpu.vector_store %arg6[%c0_12, %c0_13], %19 {strides = array<i32>} : memref<128x16xf32, #tpu.memory_space<vmem>>, vector<128x16xf32>,
    return
  }
  func.func @transform_0(%arg0: i32) -> (i32, i32) {
    %c0_i32 = arith.constant 0 : i32
    %c0_i32_0 = arith.constant 0 : i32
    return %arg0, %c0_i32 : i32, i32
  }
  func.func @transform_1(%arg0: i32) -> (i32, i32) {
    %c0_i32 = arith.constant 0 : i32
    %c0_i32_0 = arith.constant 0 : i32
    %c0_i32_1 = arith.constant 0 : i32
    return %c0_i32, %c0_i32_0 : i32, i32
  }
  func.func @transform_2(%arg0: i32) -> (i32, i32) {
    %c0_i32 = arith.constant 0 : i32
    %c0_i32_0 = arith.constant 0 : i32
    %c0_i32_1 = arith.constant 0 : i32
    return %c0_i32, %c0_i32_0 : i32, i32
  }
  func.func @transform_3(%arg0: i32) -> (i32, i32) {
    %c0_i32 = arith.constant 0 : i32
    %c0_i32_0 = arith.constant 0 : i32
    %c0_i32_1 = arith.constant 0 : i32
    return %c0_i32, %c0_i32_0 : i32, i32
  }
  func.func @transform_4(%arg0: i32) -> (i32, i32) {
    %c0_i32 = arith.constant 0 : i32
    %c0_i32_0 = arith.constant 0 : i32
    %c0_i32_1 = arith.constant 0 : i32
    return %c0_i32, %c0_i32_0 : i32, i32
  }
  func.func @transform_5(%arg0: i32) -> (i32, i32) {
    %c0_i32 = arith.constant 0 : i32
    %c0_i32_0 = arith.constant 0 : i32
    return %arg0, %c0_i32 : i32, i32
  }
}

</mosaic_0001>

<bundles_post_ra>
// kernel: tpu_custom_call.1
= control target key start
LH: loop header
LB: loop body
LE: loop exit
PB: predicated region body
PF: predicated region fallthrough
CT: control target
= control target key end

     0   :  { %s1398_s18 = smov 0   ;;  %s1400_s19 = smov 0   ;;  %s1646_s0 = inlined_call_operand.vmem [shape: f32[200,32], index: 0, kind: input, shape index: {}]   ;;  %s1647_s1 = inlined_call_operand.vmem [shape: bf16[32,64], index: 1, kind: input, shape index: {}]   ;;  %s1648_s2 = inlined_call_operand.vmem [shape: f32[1,64], index: 2, kind: input, shape index: {}]   ;;  %s1649_s3 = inlined_call_operand.vmem [shape: bf16[64,16], index: 3, kind: input, shape index: {}]   ;;  %s1650_s4 = inlined_call_operand.vmem [shape: f32[1,16], index: 4, kind: input, shape index: {}]   ;;  %s1651_s5 = inlined_call_operand.vmem [shape: f32[200,16], index: 5, kind: output, shape index: {}]  }
   0x1   :  { %s1402_s20 = smov 0  }
   0x2 LB: > { %s1411_s21 = sadd.s32 4294967295, %s1334_s20   ;;  %s1413_s22 = sadd.s32 1, %s1334_s20   ;;  %s1334_s20 = sphi %s1402_s20, %s1658_s20   ;;  %s1330_s19 = sphi %s1400_s19, %s1657_s19   ;;  %s1326_s18 = sphi %s1398_s18, %s1656_s18  }
   0x3   : > { %s129_s23 = ssub.s32 %s1334_s20, %s1413_s22  ;;  %s132_s24 = sadd.s32 1, %s1330_s19 }
   0x4   : > { %p130_p0 = scmp.eq.s32.totalorder %s129_s23, 0  ;;  %p142_p1 = scmp.ne.s32.totalorder %s1330_s19, %s1326_s18 }
   0x5   : > { %p143_p2 = scmp.eq.s32.totalorder %s1411_s21, 1  ;;  %p992_p3 = scmp.ge.s32.totalorder %s1334_s20, 1 }
   0x6   : > { %s1421_s25 = scalar_select %p130_p0, %s1330_s19, %s132_s24  }
   0x7   : > { %p1423_p4 = por %p143_p2, %p142_p1  ;;  %p196_p5 = scmp.lt.s32.totalorder %s1334_s20, 3 }
   0x9   : > { %p197_p6 = pnand %p992_p3, %p196_p5 }
   0xa   : > { %v1210_v0 = vld [vmem:[%s1647_s1] sm:$0xff] (!%p197_p6)   ;;  %s1431_s29 = sshll.u32 (!%p197_p6), %s1411_s21, 4  ;;  %v1211_v1 = vld [vmem:[%s1647_s1 + $0x8] sm:$0xff] (!%p197_p6)   ;;  %vm294_vm0 = vcmask (!%p197_p6), 261120   ;;  %v1214_v28 = vld [vmem:[%s1649_s3 + $0x10] sm:$0xff] (!%p197_p6)   ;;  %vm479_vm1 = vcmask (!%p197_p6), 523264  }
   0xb   : > { %200 = sbr.rel (%p197_p6) target bundleno = 566 (0x236), region = 40  ;;  %p232_p7 = scmp.lt.s32.totalorder (!%p197_p6), %s1431_s29, 24  ;;  %1078 = vmatprep.subr.bf16.mxu0 (!%p197_p6), %v1210_v0  ;;  %v1212_v2 = vld [vmem:[%s1649_s3] sm:$0xff] (!%p197_p6)   ;;  %v1213_v3 = vld [vmem:[%s1649_s3 + $0x8] sm:$0xff] (!%p197_p6)   ;;  %v1215_v29 = vld [vmem:[%s1649_s3 + $0x18] sm:$0xff] (!%p197_p6)   ;;  %vm697_vm2 = vcmask (!%p197_p6), 130048  }
   0xc   : > { %1079 = vmatpush3.bf16.msra.mxu0 (!%p197_p6), %v1210_v0  ;;  %1098 = vmatprep.subr.bf16.mxu1 (!%p197_p6), %v1212_v2  ;;  %v996_v30 = vld [vmem:[%s1648_s2] ss:$0 sm:$0xff] (!%p197_p6)  ;;  %s224_s6 = sand.u32 (!%p197_p6), 1, %s1326_s18  }
   0xd   : > { %1080 = vmatprep.subr.bf16.mxu0 (!%p197_p6), %v1211_v1  ;;  %1099 = vmatpush3.bf16.msra.mxu1 (!%p197_p6), %v1212_v2  ;;  %s993_s7 = sshll.u32 (!%p197_p6), %s224_s6, 7 }
   0xe   : > { %1100 = vmatprep.subr.bf16.mxu1 (!%p197_p6), %v1213_v3  ;;  %s1512_s18 = scalar_lea.vmem (!%p197_p6), [#allocation2], %s993_s7  }
  0x10   : > { %1081 = vmatpush3.bf16.msra.mxu0 (!%p197_p6), %v1211_v1 }
  0x11   : > { %1101 = vmatpush3.bf16.msra.mxu1 (!%p197_p6), %v1213_v3 }
  0x12   : > { %s233_s9 = scalar_select %p232_p7, %s1431_s29, 24  ;;  %1102 = vmatprep.subr.bf16.mxu1 %v1214_v28 }
  0x13   : > { %s722_s8 = ssub.s32 (%p1423_p4), 25, %s1431_s29 }
  0x14   : > { %s995_s12 = sshll.u32 %s233_s9, 3  ;;  %s1053_s9 = sshll.u32 (%p1423_p4), %s1411_s21, 7 }
  0x15   : > { %s1447_s15 = scalar_lea.vmem %s1646_s0, %s995_s12  ;;  %1103 = vmatpush3.bf16.msra.mxu1 %v1214_v28  ;;  %p723_p8 = scmp.lt.s32.totalorder (%p1423_p4), %s722_s8, 16 }
  0x16   : > { %v247_v4 = vld [vmem:[%s1447_s15] sm:$0xff]  ;;  %v248_v5 = vld [vmem:[%s1447_s15 + $0x8] sm:$0xff]  ;;  %v249_v6 = vld [vmem:[%s1447_s15 + $0x10] sm:$0xff]  ;;  %1104 = vmatprep.subr.bf16.mxu1 %v1215_v29  ;;  %s1553_s12 = scalar_lea.vmem (%p1423_p4), %s1651_s5, %s1053_s9  }
  0x17   : > { %v263_v7 = vpack.c.bf16 %v248_v5, %v247_v4  ;;  %v250_v8 = vld [vmem:[%s1447_s15 + $0x18] sm:$0xff]  ;;  %v251_v9 = vld [vmem:[%s1447_s15 + $0x20] sm:$0xff]  ;;  %v252_v10 = vld [vmem:[%s1447_s15 + $0x28] sm:$0xff] }
  0x18   : > { %v264_v11 = vpack.c.bf16 %v250_v8, %v249_v6  ;;  %v265_v12 = vpack.c.bf16 %v252_v10, %v251_v9  ;;  %v253_v13 = vld [vmem:[%s1447_s15 + $0x30] sm:$0xff]  ;;  %v254_v14 = vld [vmem:[%s1447_s15 + $0x38] sm:$0xff]  ;;  %v255_v15 = vld [vmem:[%s1447_s15 + $0x40] sm:$0xff] }
  0x19   : > { %1082 = vmatprep.mubr.msk.bf16.mxu0 %vm294_vm0, %v263_v7  ;;  %v256_v16 = vld [vmem:[%s1447_s15 + $0x48] sm:$0xff]  ;;  %v266_v17 = vpack.c.bf16 %v254_v14, %v253_v13  ;;  %v257_v19 = vld [vmem:[%s1447_s15 + $0x50] sm:$0xff]  ;;  %v258_v20 = vld [vmem:[%s1447_s15 + $0x58] sm:$0xff]  ;;  %1105 = vmatpush3.bf16.msra.mxu1 %v1215_v29 }
  0x1a   : > { %1083 = vmatmul.mubr.msk.bf16.vlgmr.msra.gmra.mrb[0].mxu0 %vm294_vm0, %v264_v11  ;;  %v267_v18 = vpack.c.bf16 %v256_v16, %v255_v15  ;;  %v259_v21 = vld [vmem:[%s1447_s15 + $0x60] sm:$0xff]  ;;  %v260_v22 = vld [vmem:[%s1447_s15 + $0x68] sm:$0xff]  ;;  %v268_v23 = vpack.c.bf16 %v258_v20, %v257_v19  ;;  %v261_v25 = vld [vmem:[%s1447_s15 + $0x70] sm:$0xff] }
  0x1b   : > { %1086 = vmatprep.mubr.msk.bf16.mxu0 %vm294_vm0, %v265_v12  ;;  %v269_v24 = vpack.c.bf16 %v260_v22, %v259_v21  ;;  %v262_v26 = vld [vmem:[%s1447_s15 + $0x78] sm:$0xff] }
  0x1c   : > { %v270_v27 = vpack.c.bf16 %v262_v26, %v261_v25 }
  0x22   : > { %1087 = vmatmul.mubr.msk.bf16.gmra.mrb[4].mxu0 %vm294_vm0, %v266_v17 }
  0x23   : > { %1090 = vmatprep.mubr.msk.bf16.mxu0 %vm294_vm0, %v267_v18 }
  0x2a   : > { %1091 = vmatmul.mubr.msk.bf16.gmra.mrb[8].mxu0 %vm294_vm0, %v268_v23  ;;  %v1493_v23 = vld [vmem:[%s1650_s4] ss:$0 sm:$0xff] }
  0x2b   : > { %1094 = vmatprep.mubr.msk.bf16.mxu0 %vm294_vm0, %v269_v24 }
  0x32   : > { %1095 = vmatmul.mubr.msk.bf16.gmra.mrb[12].mxu0 %vm294_vm0, %v270_v27 }
  0xed   : > { %v1084_v31 = vpop.f32.mrb[0].mxu0 }
  0xee   : > { %v362_v32 = vadd.f32 %v1084_v31, %v996_v30  ;;  %v353_v33 = vpop.f32.mrb[1].mxu0 }
  0xef   : > { %v354_v34 = vadd.f32 %v996_v30, %v353_v33  ;;  %v1085_v35 = vpop.f32.mrb[2].mxu0 }
  0xf0   : > { %v365_v36 = vadd.f32 %v1085_v35, %v996_v30  ;;  %v356_v37 = vpop.f32.mrb[3].mxu0  ;;  %v418_v39 = vmax.f32 %v362_v32, 0.0 }
  0xf1   : > { %v357_v38 = vadd.f32 %v996_v30, %v356_v37  ;;  %v416_v41 = vmax.f32 %v354_v34, 0.0 }
  0xf2   : > { %v419_v40 = vmax.f32 %v365_v36, 0.0 }
  0xf3   : > { %v417_v42 = vmax.f32 %v357_v38, 0.0 }
  0xf4   : > { %v433_v43 = vpack.c.bf16 %v419_v40, %v418_v39 }
  0xf5   : > { %v1088_v44 = vpop.f32.mrb[4].mxu0  ;;  %v432_v45 = vpack.c.bf16 %v417_v42, %v416_v41 }
  0xf6   : > { %v378_v46 = vadd.f32 %v1088_v44, %v996_v30  ;;  %v369_v47 = vpop.f32.mrb[5].mxu0 }
  0xf7   : > { %v370_v48 = vadd.f32 %v996_v30, %v369_v47  ;;  %v1089_v49 = vpop.f32.mrb[6].mxu0  ;;  %1106 = vmatprep.mubr.msk.bf16.mxu1 %vm479_vm1, %v432_v45 }
  0xf8   : > { %v381_v50 = vadd.f32 %v1089_v49, %v996_v30  ;;  %v372_v51 = vpop.f32.mrb[7].mxu0  ;;  %1107 = vmatmul.mubr.msk.bf16.vlgmr.msra.gmra.mrb[0].mxu1 %vm479_vm1, %v433_v43  ;;  %v422_v53 = vmax.f32 %v378_v46, 0.0 }
  0xf9   : > { %v373_v52 = vadd.f32 %v996_v30, %v372_v51  ;;  %v420_v55 = vmax.f32 %v370_v48, 0.0 }
  0xfa   : > { %v423_v54 = vmax.f32 %v381_v50, 0.0 }
  0xfb   : > { %v421_v56 = vmax.f32 %v373_v52, 0.0 }
  0xfc   : > { %v435_v57 = vpack.c.bf16 %v423_v54, %v422_v53 }
  0xfd   : > { %v434_v58 = vpack.c.bf16 %v421_v56, %v420_v55  ;;  %v1092_v59 = vpop.f32.mrb[8].mxu0 }
  0xfe   : > { %v394_v60 = vadd.f32 %v1092_v59, %v996_v30  ;;  %v385_v61 = vpop.f32.mrb[9].mxu0 }
  0xff   : > { %v386_v62 = vadd.f32 %v996_v30, %v385_v61  ;;  %v1093_v63 = vpop.f32.mrb[10].mxu0  ;;  %1110 = vmatprep.mubr.msk.bf16.mxu1 %vm479_vm1, %v434_v58 }
 0x100   : > { %v397_v0 = vadd.f32 %v1093_v63, %v996_v30  ;;  %v388_v1 = vpop.f32.mrb[11].mxu0  ;;  %1111 = vmatmul.mubr.msk.bf16.gmra.mrb[4].mxu1 %vm479_vm1, %v435_v57  ;;  %v426_v3 = vmax.f32 %v394_v60, 0.0 }
 0x101   : > { %v389_v2 = vadd.f32 %v996_v30, %v388_v1  ;;  %v424_v5 = vmax.f32 %v386_v62, 0.0 }
 0x102   : > { %v427_v4 = vmax.f32 %v397_v0, 0.0 }
 0x103   : > { %v425_v6 = vmax.f32 %v389_v2, 0.0 }
 0x104   : > { %v437_v7 = vpack.c.bf16 %v427_v4, %v426_v3 }
 0x105   : > { %v436_v8 = vpack.c.bf16 %v425_v6, %v424_v5  ;;  %v1096_v9 = vpop.f32.mrb[12].mxu0 }
 0x106   : > { %v410_v10 = vadd.f32 %v1096_v9, %v996_v30  ;;  %v401_v11 = vpop.f32.mrb[13].mxu0 }
 0x107   : > { %v402_v12 = vadd.f32 %v996_v30, %v401_v11  ;;  %v1097_v13 = vpop.f32.mrb[14].mxu0  ;;  %1114 = vmatprep.mubr.msk.bf16.mxu1 %vm479_vm1, %v436_v8 }
 0x108   : > { %v413_v14 = vadd.f32 %v1097_v13, %v996_v30  ;;  %v404_v15 = vpop.f32.mrb[15].mxu0  ;;  %1115 = vmatmul.mubr.msk.bf16.gmra.mrb[8].mxu1 %vm479_vm1, %v437_v7  ;;  %v430_v17 = vmax.f32 %v410_v10, 0.0 }
 0x109   : > { %v405_v16 = vadd.f32 %v996_v30, %v404_v15  ;;  %v428_v19 = vmax.f32 %v402_v12, 0.0 }
 0x10a   : > { %v431_v18 = vmax.f32 %v413_v14, 0.0 }
 0x10b   : > { %v429_v20 = vmax.f32 %v405_v16, 0.0 }
 0x10c   : > { %v439_v21 = vpack.c.bf16 %v431_v18, %v430_v17 }
 0x10d   : > { %v438_v22 = vpack.c.bf16 %v429_v20, %v428_v19 }
 0x10f   : > { %1118 = vmatprep.mubr.msk.bf16.mxu1 %vm479_vm1, %v438_v22 }
 0x110   : > { %1119 = vmatmul.mubr.msk.bf16.gmra.mrb[12].mxu1 %vm479_vm1, %v439_v21 }
 0x1cb   : > { %v1108_v24 = vpop.f32.mrb[0].mxu1 }
 0x1cc   : > { %v547_v25 = vadd.f32 %v1108_v24, %v1493_v23  ;;  %v538_v26 = vpop.f32.mrb[1].mxu1 }
 0x1cd   : > { %v539_v27 = vadd.f32 %v1493_v23, %v538_v26  ;;  %v1109_v28 = vpop.f32.mrb[2].mxu1 }
 0x1ce   : > { %v1022_v29 = vmul.f32 -1.442695, %v547_v25  ;;  %v550_v30 = vadd.f32 %v1109_v28, %v1493_v23  ;;  %v541_v31 = vpop.f32.mrb[3].mxu1 }
 0x1cf   : > { %v1020_v32 = vmul.f32 -1.442695, %v539_v27  ;;  %v542_v33 = vadd.f32 %v1493_v23, %v541_v31 }
 0x1d0   : > { %1216 = vpow2.f32 %v1022_v29  ;;  %v1023_v34 = vmul.f32 -1.442695, %v550_v30 }
 0x1d1   : > { %1218 = vpow2.f32 %v1020_v32  ;;  %v1021_v35 = vmul.f32 -1.442695, %v542_v33 }
 0x1d2   : > { %1220 = vpow2.f32 %v1023_v34 }
 0x1d3   : > { %1222 = vpow2.f32 %v1021_v35  ;;  %v1112_v36 = vpop.f32.mrb[4].mxu1 }
 0x1d4   : > { %v563_v37 = vadd.f32 %v1112_v36, %v1493_v23  ;;  %v554_v38 = vpop.f32.mrb[5].mxu1 }
 0x1d5   : > { %v555_v39 = vadd.f32 %v1493_v23, %v554_v38  ;;  %v1113_v40 = vpop.f32.mrb[6].mxu1 }
 0x1d6   : > { %v1026_v41 = vmul.f32 -1.442695, %v563_v37  ;;  %v566_v42 = vadd.f32 %v1113_v40, %v1493_v23  ;;  %v557_v43 = vpop.f32.mrb[7].mxu1 }
 0x1d7   : > { %v1024_v44 = vmul.f32 -1.442695, %v555_v39  ;;  %v558_v45 = vadd.f32 %v1493_v23, %v557_v43 }
 0x1d8   : > { %1224 = vpow2.f32 %v1026_v41  ;;  %v1027_v46 = vmul.f32 -1.442695, %v566_v42 }
 0x1d9   : > { %1226 = vpow2.f32 %v1024_v44  ;;  %v1025_v47 = vmul.f32 -1.442695, %v558_v45 }
 0x1da   : > { %v1217_v48 = vpop.eup %1216  ;;  %1228 = vpow2.f32 %v1027_v46 }
 0x1db   : > { %v1219_v49 = vpop.eup %1218  ;;  %v651_v50 = vadd.f32 1.0, %v1217_v48  ;;  %1230 = vpow2.f32 %v1025_v47  ;;  %v1116_v51 = vpop.f32.mrb[8].mxu1 }
 0x1dc   : > { %v1221_v52 = vpop.eup %1220  ;;  %v649_v53 = vadd.f32 1.0, %v1219_v49  ;;  %v579_v54 = vadd.f32 %v1116_v51, %v1493_v23  ;;  %v570_v55 = vpop.f32.mrb[9].mxu1 }
 0x1dd   : > { %v1223_v56 = vpop.eup %1222  ;;  %1232 = vrcp.f32 %v651_v50  ;;  %v652_v57 = vadd.f32 1.0, %v1221_v52  ;;  %v571_v58 = vadd.f32 %v1493_v23, %v570_v55  ;;  %v1117_v59 = vpop.f32.mrb[10].mxu1 }
 0x1de   : > { %1234 = vrcp.f32 %v649_v53  ;;  %v650_v60 = vadd.f32 1.0, %v1223_v56  ;;  %v1030_v61 = vmul.f32 -1.442695, %v579_v54  ;;  %v582_v62 = vadd.f32 %v1117_v59, %v1493_v23  ;;  %v573_v63 = vpop.f32.mrb[11].mxu1 }
 0x1df   : > { %1236 = vrcp.f32 %v652_v57  ;;  %v1028_v0 = vmul.f32 -1.442695, %v571_v58  ;;  %v574_v1 = vadd.f32 %v1493_v23, %v573_v63 }
 0x1e0   : > { %1238 = vrcp.f32 %v650_v60  ;;  %v1031_v2 = vmul.f32 -1.442695, %v582_v62 }
 0x1e1   : > { %1240 = vpow2.f32 %v1030_v61  ;;  %v1029_v3 = vmul.f32 -1.442695, %v574_v1 }
 0x1e2   : > { %v1225_v4 = vpop.eup %1224  ;;  %1242 = vpow2.f32 %v1028_v0 }
 0x1e3   : > { %v1227_v5 = vpop.eup %1226  ;;  %v655_v6 = vadd.f32 1.0, %v1225_v4  ;;  %1244 = vpow2.f32 %v1031_v2  ;;  %v1120_v7 = vpop.f32.mrb[12].mxu1 }
 0x1e4   : > { %v1229_v8 = vpop.eup %1228  ;;  %v653_v9 = vadd.f32 1.0, %v1227_v5  ;;  %1246 = vpow2.f32 %v1029_v3  ;;  %v595_v10 = vadd.f32 %v1120_v7, %v1493_v23  ;;  %v586_v11 = vpop.f32.mrb[13].mxu1 }
 0x1e5   : > { %v1231_v12 = vpop.eup %1230  ;;  %1248 = vrcp.f32 %v655_v6  ;;  %v656_v13 = vadd.f32 1.0, %v1229_v8  ;;  %v587_v14 = vadd.f32 %v1493_v23, %v586_v11  ;;  %v1121_v15 = vpop.f32.mrb[14].mxu1 }
 0x1e6   : > { %1250 = vrcp.f32 %v653_v9  ;;  %v654_v16 = vadd.f32 1.0, %v1231_v12  ;;  %v1034_v17 = vmul.f32 -1.442695, %v595_v10  ;;  %v598_v18 = vadd.f32 %v1121_v15, %v1493_v23  ;;  %v589_v19 = vpop.f32.mrb[15].mxu1 }
 0x1e7   : > { %v1233_v20 = vpop.eup %1232  ;;  %1252 = vrcp.f32 %v656_v13  ;;  %v1032_v21 = vmul.f32 -1.442695, %v587_v14  ;;  %v590_v22 = vadd.f32 %v1493_v23, %v589_v19 }
 0x1e8   : > { %v1235_v24 = vpop.eup %1234  ;;  %700 = vst.msk [vmem:[%s1512_s18 + $0x10] sm:$0xff] %vm697_vm2, %v1233_v20  ;;  %1254 = vrcp.f32 %v654_v16  ;;  %v1035_v25 = vmul.f32 -1.442695, %v598_v18 }
 0x1e9   : > { %v1237_v26 = vpop.eup %1236  ;;  %698 = vst.msk [vmem:[%s1512_s18] sm:$0xff] %vm697_vm2, %v1235_v24  ;;  %1256 = vpow2.f32 %v1034_v17  ;;  %v1033_v27 = vmul.f32 -1.442695, %v590_v22 }
 0x1ea   : > { %v1239_v28 = vpop.eup %1238  ;;  %701 = vst.msk [vmem:[%s1512_s18 + $0x18] sm:$0xff] %vm697_vm2, %v1237_v26  ;;  %1258 = vpow2.f32 %v1032_v21 }
 0x1eb   : > { %v1241_v23 = vpop.eup %1240  ;;  %699 = vst.msk [vmem:[%s1512_s18 + $0x8] sm:$0xff] %vm697_vm2, %v1239_v28  ;;  %1260 = vpow2.f32 %v1035_v25 }
 0x1ec   : > { %v1243_v29 = vpop.eup %1242  ;;  %v659_v30 = vadd.f32 1.0, %v1241_v23  ;;  %1262 = vpow2.f32 %v1033_v27 }
 0x1ed   : > { %v1245_v31 = vpop.eup %1244  ;;  %v657_v32 = vadd.f32 1.0, %v1243_v29 }
 0x1ee   : > { %v1247_v33 = vpop.eup %1246  ;;  %1264 = vrcp.f32 %v659_v30  ;;  %v660_v34 = vadd.f32 1.0, %v1245_v31 }
 0x1ef   : > { %v1249_v35 = vpop.eup %1248  ;;  %1266 = vrcp.f32 %v657_v32  ;;  %v658_v36 = vadd.f32 1.0, %v1247_v33 }
 0x1f0   : > { %v1251_v37 = vpop.eup %1250  ;;  %704 = vst.msk [vmem:[%s1512_s18 + $0x30] sm:$0xff] %vm697_vm2, %v1249_v35  ;;  %1268 = vrcp.f32 %v660_v34 }
 0x1f1   : > { %v1253_v38 = vpop.eup %1252  ;;  %702 = vst.msk [vmem:[%s1512_s18 + $0x20] sm:$0xff] %vm697_vm2, %v1251_v37  ;;  %1270 = vrcp.f32 %v658_v36 }
 0x1f2   : > { %v1255_v39 = vpop.eup %1254  ;;  %705 = vst.msk [vmem:[%s1512_s18 + $0x38] sm:$0xff] %vm697_vm2, %v1253_v38 }
 0x1f3   : > { %v1257_v40 = vpop.eup %1256  ;;  %703 = vst.msk [vmem:[%s1512_s18 + $0x28] sm:$0xff] %vm697_vm2, %v1255_v39 }
 0x1f4   : > { %v1259_v41 = vpop.eup %1258  ;;  %v663_v42 = vadd.f32 1.0, %v1257_v40 }
 0x1f5   : > { %v1261_v43 = vpop.eup %1260  ;;  %v661_v44 = vadd.f32 1.0, %v1259_v41 }
 0x1f6   : > { %v1263_v45 = vpop.eup %1262  ;;  %1272 = vrcp.f32 %v663_v42  ;;  %v664_v46 = vadd.f32 1.0, %v1261_v43 }
 0x1f7   : > { %1274 = vrcp.f32 %v661_v44  ;;  %v662_v47 = vadd.f32 1.0, %v1263_v45 }
 0x1f8   : > { %v1265_v48 = vpop.eup %1264  ;;  %1276 = vrcp.f32 %v664_v46 }
 0x1f9   : > { %v1267_v49 = vpop.eup %1266  ;;  %708 = vst.msk [vmem:[%s1512_s18 + $0x50] sm:$0xff] %vm697_vm2, %v1265_v48  ;;  %1278 = vrcp.f32 %v662_v47 }
 0x1fa   : > { %v1269_v50 = vpop.eup %1268  ;;  %706 = vst.msk [vmem:[%s1512_s18 + $0x40] sm:$0xff] %vm697_vm2, %v1267_v49 }
 0x1fb   : > { %v1271_v51 = vpop.eup %1270  ;;  %709 = vst.msk [vmem:[%s1512_s18 + $0x58] sm:$0xff] %vm697_vm2, %v1269_v50 }
 0x1fc   : > { %707 = vst.msk [vmem:[%s1512_s18 + $0x48] sm:$0xff] %vm697_vm2, %v1271_v51 }
 0x1fe   : > { %720 = sbr.rel (!%p1423_p4) target bundleno = 566 (0x236), region = 44 }
 0x200   : > { %v1273_v52 = vpop.eup %1272 }
 0x201   : > { %v1275_v53 = vpop.eup %1274  ;;  %712 = vst.msk [vmem:[%s1512_s18 + $0x70] sm:$0xff] %vm697_vm2, %v1273_v52 }
 0x202   : > { %v1277_v54 = vpop.eup %1276  ;;  %710 = vst.msk [vmem:[%s1512_s18 + $0x60] sm:$0xff] %vm697_vm2, %v1275_v53 }
 0x203   : > { %v1279_v55 = vpop.eup %1278  ;;  %713 = vst.msk [vmem:[%s1512_s18 + $0x78] sm:$0xff] %vm697_vm2, %v1277_v54 }
 0x204   : > { %711 = vst.msk [vmem:[%s1512_s18 + $0x68] sm:$0xff] %vm697_vm2, %v1279_v55 }
 0x205   : > { %s1660_s8 = smov (!%p723_p8, %s722_s8), 16 }
 0x206   : > { %s1038_s13 = sshll.u32 %s1660_s8, 7 }
 0x207   : > { %p1041_p9 = scmp.eq.s32.totalorder %s1038_s13, 0 }
 0x208   : > { %s1559_s14 = sshrl.u32 (!%p1041_p9), %s1660_s8, 4 }
 0x209   : > { %731 = sbr.rel (%p1041_p9) target bundleno = 566 (0x236), region = 48  ;;  %p1042_p10 = scmp.le.s32.totalorder (!%p1041_p9), %s1559_s14, 0 }
 0x210   : > { %945 = sbr.rel (%p1042_p10) target bundleno = 545 (0x221), region = 124  ;;  %s1653_s21 = smov (!%p1042_p10), %s1553_s12 }
 0x211   : > { %s1654_s26 = smov (!%p1042_p10), %s1512_s18  ;;  %s1568_s29 = smov (!%p1042_p10), 0  }
 0x212   : > { %s1570_s15 = smov (!%p1042_p10), 0  }
 0x217 LB: >> { %v823_v56 = vld [vmem:[%s1342_s26] sm:$0xff]  ;;  %v825_v57 = vld [vmem:[%s1342_s26 + $0x8] sm:$0xff]  ;;  %v827_v58 = vld [vmem:[%s1342_s26 + $0x10] sm:$0xff]  ;;  %s855_s16 = sadd.s32 1, %s1346_s29  ;;  %s817_s15 = sadd.s32 1, %s1350_s15   ;;  %s1350_s15 = sphi %s1570_s15, %s817_s15   ;;  %s1346_s29 = sphi %s1568_s29, %s1655_s29   ;;  %s1342_s26 = sphi %s1654_s26, %s860_s26   ;;  %s1338_s21 = sphi %s1653_s21, %s861_s21  }
 0x218   : >> { %824 = vst [vmem:[%s1338_s21] sm:$0xff] %v823_v56  ;;  %826 = vst [vmem:[%s1338_s21 + $0x8] sm:$0xff] %v825_v57  ;;  %v829_v59 = vld [vmem:[%s1342_s26 + $0x18] sm:$0xff]  ;;  %v831_v60 = vld [vmem:[%s1342_s26 + $0x20] sm:$0xff]  ;;  %p856_p11 = scmp.ge.s32.totalorder %s855_s16, %s1559_s14  ;;  %p816_p12 = scmp.ge.s32.totalorder %s817_s15, %s1559_s14 }
 0x219   : >> { %828 = vst [vmem:[%s1338_s21 + $0x10] sm:$0xff] %v827_v58  ;;  %v833_v61 = vld [vmem:[%s1342_s26 + $0x28] sm:$0xff]  ;;  %830 = vst [vmem:[%s1338_s21 + $0x18] sm:$0xff] %v829_v59  ;;  %v835_v62 = vld [vmem:[%s1342_s26 + $0x30] sm:$0xff] }
 0x21a   : >> { %832 = vst [vmem:[%s1338_s21 + $0x20] sm:$0xff] %v831_v60  ;;  %834 = vst [vmem:[%s1338_s21 + $0x28] sm:$0xff] %v833_v61  ;;  %v837_v63 = vld [vmem:[%s1342_s26 + $0x38] sm:$0xff]  ;;  %v839_v0 = vld [vmem:[%s1342_s26 + $0x40] sm:$0xff]  ;;  %s1662_s16 = smov (%p856_p11, %s855_s16), 0  ;;  %819 = sbr.rel (!%p816_p12) target bundleno = 535 (0x217), region = 130 }
 0x21b   : >> { %836 = vst [vmem:[%s1338_s21 + $0x30] sm:$0xff] %v835_v62  ;;  %838 = vst [vmem:[%s1338_s21 + $0x38] sm:$0xff] %v837_v63  ;;  %v841_v1 = vld [vmem:[%s1342_s26 + $0x48] sm:$0xff]  ;;  %v843_v2 = vld [vmem:[%s1342_s26 + $0x50] sm:$0xff]  ;;  %s1043_s17 = sshll.u32 %s1662_s16, 7  ;;  %s1655_s29 = smov %s1662_s16 }
 0x21c   : >> { %840 = vst [vmem:[%s1338_s21 + $0x40] sm:$0xff] %v839_v0  ;;  %v845_v3 = vld [vmem:[%s1342_s26 + $0x58] sm:$0xff]  ;;  %842 = vst [vmem:[%s1338_s21 + $0x48] sm:$0xff] %v841_v1  ;;  %v847_v4 = vld [vmem:[%s1342_s26 + $0x60] sm:$0xff] }
 0x21d   : >> { %844 = vst [vmem:[%s1338_s21 + $0x50] sm:$0xff] %v843_v2  ;;  %846 = vst [vmem:[%s1338_s21 + $0x58] sm:$0xff] %v845_v3  ;;  %v849_v5 = vld [vmem:[%s1342_s26 + $0x68] sm:$0xff]  ;;  %v851_v6 = vld [vmem:[%s1342_s26 + $0x70] sm:$0xff] }
 0x21e   : >> { %848 = vst [vmem:[%s1338_s21 + $0x60] sm:$0xff] %v847_v4  ;;  %850 = vst [vmem:[%s1338_s21 + $0x68] sm:$0xff] %v849_v5  ;;  %v853_v7 = vld [vmem:[%s1342_s26 + $0x78] sm:$0xff]  ;;  %s860_s26 = scalar_lea.vmem %s1512_s18, %s1043_s17 [#allocation2]  }
 0x21f   : >> { %852 = vst [vmem:[%s1338_s21 + $0x70] sm:$0xff] %v851_v6  ;;  %854 = vst [vmem:[%s1338_s21 + $0x78] sm:$0xff] %v853_v7  ;;  %s861_s21 = scalar_lea.vmem %s1553_s12, %s1043_s17  }
 0x221 PF: > { %s1628_s20 = sand.u32 15, %s1660_s8   ;;  %s1054_s23 = sshll.u32 %s1559_s14, 7 }
 0x222   : > { %s866_s24 = scalar_lea.vmem %s1512_s18, %s1054_s23 [#allocation2]   ;;  %s868_s27 = scalar_lea.vmem %s1553_s12, %s1054_s23  }
 0x223   : > { %p1048_p13 = scmp.le.s32.totalorder %s1628_s20, 0 }
 0x224   : > { %s1352_s28 = smov (!%p1048_p13), %s868_s27   ;;  %s1356_s30 = smov (!%p1048_p13), %s866_s24  }
 0x225   : > { %959 = sbr.rel (%p1048_p13) target bundleno = 566 (0x236), region = 135  ;;  %s1360_s6 = smov (!%p1048_p13), 0  }
 0x226   : > { %s1364_s7 = smov (!%p1048_p13), 0  }
 0x22c LB: >> { %v878_v8 = vld [vmem:[%s1358_s30] sm:$0xff]  ;;  %s880_s8 = sadd.s32 1, %s1362_s6  ;;  %s872_s7 = sadd.s32 1, %s1366_s7   ;;  %s1366_s7 = sphi %s1364_s7, %s872_s7   ;;  %s1362_s6 = sphi %s1360_s6, %s1361_s6   ;;  %s1358_s30 = sphi %s1356_s30, %s885_s30   ;;  %s1354_s28 = sphi %s1352_s28, %s886_s28  }
 0x22d   : >> { %879 = vst [vmem:[%s1354_s28] sm:$0xff] %v878_v8  ;;  %p881_p0 = scmp.ge.s32.totalorder %s880_s8, %s1628_s20  ;;  %p871_p1 = scmp.ge.s32.totalorder %s872_s7, %s1628_s20 }
 0x22f   : >> { %s1664_s8 = smov (%p881_p0, %s880_s8), 0  ;;  %874 = sbr.rel (!%p871_p1) target bundleno = 556 (0x22c), region = 141 }
 0x230   : >> { %s1049_s18 = sshll.u32 %s1664_s8, 3  ;;  %s1361_s6 = smov %s1664_s8  }
 0x231   : >> { %s885_s30 = scalar_lea.vmem %s866_s24, %s1049_s18 [#allocation2]   ;;  %s886_s28 = scalar_lea.vmem %s868_s27, %s1049_s18  }
 0x236 PF: > { %p12_p2 = scmp.ge.s32.totalorder %s1413_s22, 4   ;;  %s1656_s18 = smov %s1330_s19 }
 0x237   : > { %s1657_s19 = smov %s1421_s25  ;;  %s1658_s20 = smov %s1413_s22 }
 0x238   :  { %14 = sbr.rel (!%p12_p2) target bundleno = 2 (0x2), region = 152 }

</bundles_post_ra>
